<compile_context>
chip_gen: v7x
topology: tpu7x:2x2x1
jax: 0.10.0
libtpu: 0.0.40
codegen_flags: <defaults>
</compile_context>

<pallas_src>
import functools

import jax
import jax.numpy as jnp
from jax.experimental import pallas as pl
from jax.experimental.pallas import tpu as pltpu

H1, H2 = 400, 300            # PyTorch hidden sizes
H1_PAD, H2_PAD = 512, 384    # lane-padded (multiples of 128)
LANE = 128


def _round_up(x, m):
    return (x + m - 1) // m * m


def _cdiv(a, b):
    return (a + b - 1) // b


def _plan_batch_tiles(B, batch_tile, min_tiles):
    """Pad B only to a sublane multiple (8) and split into equal tiles.

    Keeps per-call padding waste minimal (instead of rounding B up to a whole
    tile) while keeping tb as large as possible to amortize the ~0.35 us
    per-grid-step overhead.  `min_tiles=2` lets v7x span both TensorCores.
    """
    b8 = _round_up(max(B, 1), 8)
    n = max(_cdiv(b8, batch_tile), min_tiles, 1)
    tb = _round_up(_cdiv(b8, n), 8)
    n = _cdiv(b8, tb)            # re-derive; rounding tb up may reduce the count
    b_pad = tb * n
    return tb, b_pad, n


def _mlp_kernel(x_ref, w1_ref, b1_ref, w2_ref, b2_ref, w3_ref, b3_ref, o_ref,
                *, in_features, out_actions):
    x = x_ref[...]            # (tb, in_f)  f32
    w1 = w1_ref[...]          # (in_f, H1_PAD) f32 (layer 1 runs on the VPU)

    if in_features <= 16:
        # Tiny contraction dim: unrolled broadcast-multiply-adds on the VPU.
        # (On v6e/v7x an 8-padded bf16 MXU dot would also be essentially free
        #  since the MXU has slack; kept on the VPU for v5e where the MXU is
        #  the binding unit and this lowering is proven.)
        acc = x[:, 0:1] * w1[0:1, :]
        for k in range(1, in_features):
            acc = acc + x[:, k:k + 1] * w1[k:k + 1, :]
        h1 = acc
    else:
        h1 = jnp.dot(x, w1, preferred_element_type=jnp.float32)
    h1 = jnp.maximum(h1 + b1_ref[...], 0.0)                        # f32 VPU

    # bf16 x bf16 -> f32-accumulated MXU matmuls; activations stay f32 elsewhere.
    h2 = jnp.dot(h1.astype(jnp.bfloat16), w2_ref[...],
                 preferred_element_type=jnp.float32)
    h2 = jnp.maximum(h2 + b2_ref[...], 0.0)

    y = jnp.dot(h2.astype(jnp.bfloat16), w3_ref[...],
                preferred_element_type=jnp.float32)
    y = y + b3_ref[...]
    # Write only the useful action columns (narrow output block; a few masked
    # vst per tile instead of a 128x-padded HBM writeback + wrapper slice).
    o_ref[...] = y[:, :out_actions].astype(o_ref.dtype)


def init_params(key, in_features, out_actions):
    """Deterministic init mimicking PyTorch's default Linear init
    (uniform(-1/sqrt(fan_in), 1/sqrt(fan_in)) for weight and bias).
    Weights are stored already transposed to (in_f, out_f)."""
    dims = [in_features, H1, H2, out_actions]
    params = []
    for i in range(3):
        fan_in, fan_out = dims[i], dims[i + 1]
        key, kw, kb = jax.random.split(key, 3)
        bound = 1.0 / jnp.sqrt(jnp.float32(fan_in))
        w = jax.random.uniform(kw, (fan_in, fan_out), jnp.float32, -bound, bound)
        b = jax.random.uniform(kb, (1, fan_out), jnp.float32, -bound, bound)
        params.append((w, b))
    return params


def prepare_params(params):
    """Zero-pad to lane-dense shapes and cast the MXU weights to bf16."""
    (w1, b1), (w2, b2), (w3, b3) = params
    in_f = w1.shape[0]
    out_actions = w3.shape[1]
    out_pad = _round_up(out_actions, LANE)

    def pad(a, rows, cols):
        return jnp.pad(a, ((0, rows - a.shape[0]), (0, cols - a.shape[1])))

    w1p = pad(w1, in_f, H1_PAD)                         # f32, used on the VPU
    b1p = pad(b1, 1, H1_PAD)
    w2p = pad(w2, H1_PAD, H2_PAD).astype(jnp.bfloat16)  # MXU operand
    b2p = pad(b2, 1, H2_PAD)
    w3p = pad(w3, H2_PAD, out_pad).astype(jnp.bfloat16)
    b3p = pad(b3, 1, out_pad)
    return {"tensors": (w1p, b1p, w2p, b2p, w3p, b3p),
            "in_features": in_f, "out_actions": out_actions}


def state_to_action_forward(obs, prepared, *, batch_tile=512, min_tiles=1):
    """obs: (B, in_features) f32 -> (B, out_actions) f32.

    batch_tile: max rows per grid step (512 amortizes per-step overhead well on
                all generations; don't over-grow on v5e).
    min_tiles:  set to 2 on v7x so the 'parallel' batch axis spans both TCs.
    """
    w1, b1, w2, b2, w3, b3 = prepared["tensors"]
    in_f = prepared["in_features"]
    out_actions = prepared["out_actions"]
    out_pad = w3.shape[1]

    B = obs.shape[0]
    tb, b_pad, n_tiles = _plan_batch_tiles(B, batch_tile, min_tiles)
    if b_pad != B:
        obs = jnp.pad(obs, ((0, b_pad - B), (0, 0)))

    const = lambda i: (0, 0)                    # weights/biases: VMEM-resident
    out = pl.pallas_call(
        functools.partial(_mlp_kernel, in_features=in_f, out_actions=out_actions),
        out_shape=jax.ShapeDtypeStruct((b_pad, out_actions), jnp.float32),
        grid=(n_tiles,),
        in_specs=[
            pl.BlockSpec((tb, in_f), lambda i: (i, 0)),     # obs tile streams
            pl.BlockSpec((in_f, H1_PAD), const),
            pl.BlockSpec((1, H1_PAD), const),
            pl.BlockSpec((H1_PAD, H2_PAD), const),
            pl.BlockSpec((1, H2_PAD), const),
            pl.BlockSpec((H2_PAD, out_pad), const),
            pl.BlockSpec((1, out_pad), const),
        ],
        out_specs=pl.BlockSpec((tb, out_actions), lambda i: (i, 0)),
        compiler_params=pltpu.CompilerParams(
            dimension_semantics=("parallel",)),
    )(obs, w1, b1, w2, b2, w3, b3)
    return out if b_pad == B else out[:B]


def reference_f32(obs, params):
    """Pure f32 reference of the original module semantics."""
    (w1, b1), (w2, b2), (w3, b3) = params
    h1 = jnp.maximum(obs @ w1 + b1, 0.0)
    h2 = jnp.maximum(h1 @ w2 + b2, 0.0)
    return h2 @ w3 + b3


def reference_prepared(obs, prepared):
    """Reference performing the same padded / bf16 math as the kernel."""
    w1, b1, w2, b2, w3, b3 = prepared["tensors"]
    out_actions = prepared["out_actions"]
    # Layer 1 as exact f32 broadcast-FMAs (matches the kernel's VPU path).
    h1 = jnp.maximum((obs[:, :, None] * w1[None, :, :]).sum(axis=1) + b1, 0.0)
    h2 = jnp.maximum(jnp.dot(h1.astype(jnp.bfloat16), w2,
                             preferred_element_type=jnp.float32) + b2, 0.0)
    y = jnp.dot(h2.astype(jnp.bfloat16), w3,
                preferred_element_type=jnp.float32) + b3
    return y[:, :out_actions]


if __name__ == "__main__":
    # Pendulum-v1: observation dim 3, action dim 1; small batch.
    B, in_features, out_actions = 8, 3, 1

    key = jax.random.PRNGKey(0)
    key, k_obs = jax.random.split(key)
    obs = jax.random.normal(k_obs, (B, in_features), jnp.float32)
    params = init_params(key, in_features, out_actions)
    prepared = prepare_params(params)

    out = jax.block_until_ready(state_to_action_forward(obs, prepared))
    assert out.shape == (B, out_actions)

    # Exact check against a reference doing the same (padded, bf16-MXU) math.
    ref_same = reference_prepared(obs, prepared)
    assert jnp.allclose(out, ref_same, atol=1e-4, rtol=1e-4), "mismatch vs prepared ref"
    # Sanity check against the pure-f32 original semantics (bf16 weight quantization).
    ref_f32 = reference_f32(obs, params)
    assert jnp.allclose(out, ref_f32, atol=5e-2, rtol=5e-2), "mismatch vs f32 ref"

    # Mid-size batch: exercises the tight batch-padding path (300 -> 304 rows, 1 tile).
    B2 = 300
    key, k2 = jax.random.split(key)
    obs2 = jax.random.normal(k2, (B2, in_features), jnp.float32)
    out2 = jax.block_until_ready(state_to_action_forward(obs2, prepared))
    assert out2.shape == (B2, out_actions)
    assert jnp.allclose(out2, reference_prepared(obs2, prepared),
                        atol=1e-4, rtol=1e-4), "mismatch vs prepared ref (batched)"

    # Larger batch: exercises a multi-tile grid and the min_tiles (v7x) knob.
    B3 = 1030
    key, k3 = jax.random.split(key)
    obs3 = jax.random.normal(k3, (B3, in_features), jnp.float32)
    out3 = jax.block_until_ready(
        state_to_action_forward(obs3, prepared, min_tiles=2))
    assert out3.shape == (B3, out_actions)
    assert jnp.allclose(out3, reference_prepared(obs3, prepared),
                        atol=1e-4, rtol=1e-4), "mismatch vs prepared ref (multi-tile)"

    print("KERNEL_OK")
</pallas_src>

<mosaic_0001>
module attributes {stable_mosaic.version = 11 : i64} {
  func.func @_mlp_kernel(%arg0: i32, %arg1: memref<8x3xf32, #tpu.memory_space<vmem>>, %arg2: memref<3x512xf32, #tpu.memory_space<vmem>>, %arg3: memref<1x512xf32, #tpu.memory_space<vmem>>, %arg4: memref<512x384xbf16, #tpu.memory_space<vmem>>, %arg5: memref<1x384xf32, #tpu.memory_space<vmem>>, %arg6: memref<384x128xbf16, #tpu.memory_space<vmem>>, %arg7: memref<1x128xf32, #tpu.memory_space<vmem>>, %arg8: memref<8x1xf32, #tpu.memory_space<vmem>>) attributes {dimension_semantics = [#tpu.dimension_semantics<parallel>], iteration_bounds = array<i64: 1>, scalar_prefetch = 0 : i64, scratch_operands = 0 : i64, tpu.core_type = #tpu.core_type<tc>, window_params = [{transform_indices = @transform_0, window_bounds = array<i64: 8, 3>}, {pipeline_mode = #tpu.pipeline_mode<synchronous>, transform_indices = @transform_1, window_bounds = array<i64: 3, 512>}, {pipeline_mode = #tpu.pipeline_mode<synchronous>, transform_indices = @transform_2, window_bounds = array<i64: 1, 512>}, {pipeline_mode = #tpu.pipeline_mode<synchronous>, transform_indices = @transform_3, window_bounds = array<i64: 512, 384>}, {pipeline_mode = #tpu.pipeline_mode<synchronous>, transform_indices = @transform_4, window_bounds = array<i64: 1, 384>}, {pipeline_mode = #tpu.pipeline_mode<synchronous>, transform_indices = @transform_5, window_bounds = array<i64: 384, 128>}, {pipeline_mode = #tpu.pipeline_mode<synchronous>, transform_indices = @transform_6, window_bounds = array<i64: 1, 128>}, {transform_indices = @transform_7, window_bounds = array<i64: 8, 1>}]} {
    %c0 = arith.constant 0 : index
    %c0_0 = arith.constant 0 : index
    %0 = vector.load %arg1[%c0, %c0_0] : memref<8x3xf32, #tpu.memory_space<vmem>>, vector<8x3xf32>
    %c0_1 = arith.constant 0 : index
    %c0_2 = arith.constant 0 : index
    %1 = vector.load %arg2[%c0_1, %c0_2] : memref<3x512xf32, #tpu.memory_space<vmem>>, vector<3x512xf32>
    %2 = vector.extract_strided_slice %0 {offsets = [0, 0], sizes = [8, 1], strides = [1, 1]} : vector<8x3xf32> to vector<8x1xf32>
    %3 = vector.extract_strided_slice %1 {offsets = [0, 0], sizes = [1, 512], strides = [1, 1]} : vector<3x512xf32> to vector<1x512xf32>
    %4 = vector.broadcast %2 : vector<8x1xf32> to vector<8x512xf32>
    %5 = vector.broadcast %3 : vector<1x512xf32> to vector<8x512xf32>
    %6 = arith.mulf %4, %5 : vector<8x512xf32>
    %7 = vector.extract_strided_slice %0 {offsets = [0, 1], sizes = [8, 1], strides = [1, 1]} : vector<8x3xf32> to vector<8x1xf32>
    %8 = vector.extract_strided_slice %1 {offsets = [1, 0], sizes = [1, 512], strides = [1, 1]} : vector<3x512xf32> to vector<1x512xf32>
    %9 = vector.broadcast %7 : vector<8x1xf32> to vector<8x512xf32>
    %10 = vector.broadcast %8 : vector<1x512xf32> to vector<8x512xf32>
    %11 = arith.mulf %9, %10 : vector<8x512xf32>
    %12 = arith.addf %6, %11 : vector<8x512xf32>
    %13 = vector.extract_strided_slice %0 {offsets = [0, 2], sizes = [8, 1], strides = [1, 1]} : vector<8x3xf32> to vector<8x1xf32>
    %14 = vector.extract_strided_slice %1 {offsets = [2, 0], sizes = [1, 512], strides = [1, 1]} : vector<3x512xf32> to vector<1x512xf32>
    %15 = vector.broadcast %13 : vector<8x1xf32> to vector<8x512xf32>
    %16 = vector.broadcast %14 : vector<1x512xf32> to vector<8x512xf32>
    %17 = arith.mulf %15, %16 : vector<8x512xf32>
    %18 = arith.addf %12, %17 : vector<8x512xf32>
    %c0_3 = arith.constant 0 : index
    %c0_4 = arith.constant 0 : index
    %19 = vector.load %arg3[%c0_3, %c0_4] : memref<1x512xf32, #tpu.memory_space<vmem>>, vector<1x512xf32>
    %20 = vector.broadcast %19 : vector<1x512xf32> to vector<8x512xf32>
    %21 = arith.addf %18, %20 : vector<8x512xf32>
    %cst = arith.constant 0.000000e+00 : f32
    %22 = vector.broadcast %cst : f32 to vector<8x512xf32>
    %23 = arith.maximumf %21, %22 : vector<8x512xf32>
    %24 = arith.truncf %23 : vector<8x512xf32> to vector<8x512xbf16>
    %c0_5 = arith.constant 0 : index
    %c0_6 = arith.constant 0 : index
    %25 = vector.load %arg4[%c0_5, %c0_6] : memref<512x384xbf16, #tpu.memory_space<vmem>>, vector<512x384xbf16>
    %cst_7 = arith.constant dense<0.000000e+00> : vector<8x384xf32>
    %26 = tpu.matmul %24, %25, %cst_7 {dimension_numbers = #tpu.dot_dimension_numbers<[1], [0], [0], [1], [0, 0, 1, 1], [], []>} : vector<8x512xbf16>, vector<512x384xbf16>, vector<8x384xf32> -> vector<8x384xf32>
    %c0_8 = arith.constant 0 : index
    %c0_9 = arith.constant 0 : index
    %27 = vector.load %arg5[%c0_8, %c0_9] : memref<1x384xf32, #tpu.memory_space<vmem>>, vector<1x384xf32>
    %28 = vector.broadcast %27 : vector<1x384xf32> to vector<8x384xf32>
    %29 = arith.addf %26, %28 : vector<8x384xf32>
    %cst_10 = arith.constant 0.000000e+00 : f32
    %30 = vector.broadcast %cst_10 : f32 to vector<8x384xf32>
    %31 = arith.maximumf %29, %30 : vector<8x384xf32>
    %32 = arith.truncf %31 : vector<8x384xf32> to vector<8x384xbf16>
    %c0_11 = arith.constant 0 : index
    %c0_12 = arith.constant 0 : index
    %33 = vector.load %arg6[%c0_11, %c0_12] : memref<384x128xbf16, #tpu.memory_space<vmem>>, vector<384x128xbf16>
    %cst_13 = arith.constant dense<0.000000e+00> : vector<8x128xf32>
    %34 = tpu.matmul %32, %33, %cst_13 {dimension_numbers = #tpu.dot_dimension_numbers<[1], [0], [0], [1], [0, 0, 1, 1], [], []>} : vector<8x384xbf16>, vector<384x128xbf16>, vector<8x128xf32> -> vector<8x128xf32>
    %c0_14 = arith.constant 0 : index
    %c0_15 = arith.constant 0 : index
    %35 = vector.load %arg7[%c0_14, %c0_15] : memref<1x128xf32, #tpu.memory_space<vmem>>, vector<1x128xf32>
    %36 = vector.broadcast %35 : vector<1x128xf32> to vector<8x128xf32>
    %37 = arith.addf %34, %36 : vector<8x128xf32>
    %38 = vector.extract_strided_slice %37 {offsets = [0, 0], sizes = [8, 1], strides = [1, 1]} : vector<8x128xf32> to vector<8x1xf32>
    %c0_16 = arith.constant 0 : index
    %c0_17 = arith.constant 0 : index
    %39 = vector.load %arg8[%c0_16, %c0_17] : memref<8x1xf32, #tpu.memory_space<vmem>>, vector<8x1xf32>
    tpu.vector_store %arg8[%c0_16, %c0_17], %38 {strides = array<i32>} : memref<8x1xf32, #tpu.memory_space<vmem>>, vector<8x1xf32>,
    return
  }
  func.func @transform_0(%arg0: i32) -> (i32, i32) {
    %c0_i32 = arith.constant 0 : i32
    %c0_i32_0 = arith.constant 0 : i32
    return %arg0, %c0_i32 : i32, i32
  }
  func.func @transform_1(%arg0: i32) -> (i32, i32) {
    %c0_i32 = arith.constant 0 : i32
    %c0_i32_0 = arith.constant 0 : i32
    %c0_i32_1 = arith.constant 0 : i32
    return %c0_i32, %c0_i32_0 : i32, i32
  }
  func.func @transform_2(%arg0: i32) -> (i32, i32) {
    %c0_i32 = arith.constant 0 : i32
    %c0_i32_0 = arith.constant 0 : i32
    %c0_i32_1 = arith.constant 0 : i32
    return %c0_i32, %c0_i32_0 : i32, i32
  }
  func.func @transform_3(%arg0: i32) -> (i32, i32) {
    %c0_i32 = arith.constant 0 : i32
    %c0_i32_0 = arith.constant 0 : i32
    %c0_i32_1 = arith.constant 0 : i32
    return %c0_i32, %c0_i32_0 : i32, i32
  }
  func.func @transform_4(%arg0: i32) -> (i32, i32) {
    %c0_i32 = arith.constant 0 : i32
    %c0_i32_0 = arith.constant 0 : i32
    %c0_i32_1 = arith.constant 0 : i32
    return %c0_i32, %c0_i32_0 : i32, i32
  }
  func.func @transform_5(%arg0: i32) -> (i32, i32) {
    %c0_i32 = arith.constant 0 : i32
    %c0_i32_0 = arith.constant 0 : i32
    %c0_i32_1 = arith.constant 0 : i32
    return %c0_i32, %c0_i32_0 : i32, i32
  }
  func.func @transform_6(%arg0: i32) -> (i32, i32) {
    %c0_i32 = arith.constant 0 : i32
    %c0_i32_0 = arith.constant 0 : i32
    %c0_i32_1 = arith.constant 0 : i32
    return %c0_i32, %c0_i32_0 : i32, i32
  }
  func.func @transform_7(%arg0: i32) -> (i32, i32) {
    %c0_i32 = arith.constant 0 : i32
    %c0_i32_0 = arith.constant 0 : i32
    return %arg0, %c0_i32 : i32, i32
  }
}

</mosaic_0001>

<bundles_post_ra>
// kernel: tpu_custom_call.1
= control target key start
LH: loop header
LB: loop body
LE: loop exit
PB: predicated region body
PF: predicated region fallthrough
CT: control target
= control target key end

     0   :  { %12 = vsyncpa [#allocation3], 0  ;;  %s1977_s0 = inlined_call_operand.vmem [shape: f32[8,3], index: 0, kind: input, shape index: {}]   ;;  %s1978_s1 = inlined_call_operand.hbm [shape: f32[3,512], index: 1, kind: input, shape index: {}]   ;;  %s1979_s2 = inlined_call_operand.vmem [shape: f32[1,512], index: 2, kind: input, shape index: {}]   ;;  %s1980_s3 = inlined_call_operand.hbm [shape: bf16[512,384], index: 3, kind: input, shape index: {}]   ;;  %s1981_s4 = inlined_call_operand.vmem [shape: f32[1,384], index: 4, kind: input, shape index: {}]   ;;  %s1982_s5 = inlined_call_operand.hbm [shape: bf16[384,128], index: 5, kind: input, shape index: {}]   ;;  %s1983_s6 = inlined_call_operand.vmem [shape: f32[1,128], index: 6, kind: input, shape index: {}]   ;;  %s1984_s7 = inlined_call_operand.vmem [shape: f32[8,1], index: 7, kind: output, shape index: {}]  }
   0x1   :  { %13 = vsyncpa [#allocation5], 0  ;;  %s1818_s24 = smov [#allocation4]   ;;  %s1748_s28 = scalar_lea.hbm %s1980_s3, 12288 }
   0x2   :  { %s33_s25 = sshll.u32 %s1818_s24, 4  ;;  %p1749_p0 = scmp.ne.s32.totalorder %s1980_s3, %s1748_s28  ;;  %s34_s25 = int_to_ptr.vmem [resolvable:$true] %s33_s25 }
   0x3   :  { %p1752_p1 = scmp.lt.u32.totalorder %s1748_s28, %s1980_s3 }
   0x5   :  { %p1754_p2 = pnand %p1752_p1, %p1749_p0 }
   0x7   :  { %1757 = shalt.err (!%p1754_p2)
}
   0x8   :  { %s1758_s10 = scalar_lea.vmem %s34_s25, 12288  ;;  %p1763_p4 = scmp.lt.s32.totalorder %s34_s25, %s34_s25 }
   0x9   :  { %p1759_p3 = scmp.ne.s32.totalorder %s34_s25, %s1758_s10  ;;  %p1764_p5 = scmp.lt.s32.totalorder %s1758_s10, %s1758_s10 }
   0xb   :  { %p1765_p6 = por %p1764_p5, %p1763_p4 }
   0xd   :  { %p1766_p7 = pnand %p1765_p6, %p1759_p3 }
   0xf   :  { %1769 = shalt.err (!%p1766_p7)
}
  0x10   :  { %s1819_s11 = smov 192   ;;  %s1820_s12 = smov 12  }
  0x11   :  { %39 = dma.hbm_to_vmem [thread:$0]  %s1980_s3, 12288, %s34_s25, [#allocation5], %s1819_s11, %s1819_s11, %s1820_s12  }
  0x12   :  { %s1821_s15 = smov [#allocation2]   ;;  %s1822_s17 = smov [#allocation6]  }
  0x13   :  { %s22_s16 = sshll.u32 %s1821_s15, 4  ;;  %s47_s18 = sshll.u32 %s1822_s17, 4  ;;  %s23_s16 = int_to_ptr.vmem [resolvable:$true] %s22_s16  ;;  %s48_s18 = int_to_ptr.vmem [resolvable:$true] %s47_s18 }
  0x14   :  { %s1770_s21 = scalar_lea.hbm %s1978_s1, 256 }
  0x15   :  { %p1771_p8 = scmp.ne.s32.totalorder %s1978_s1, %s1770_s21  ;;  %p1774_p9 = scmp.lt.u32.totalorder %s1770_s21, %s1978_s1 }
  0x17   :  { %p1776_p10 = pnand %p1774_p9, %p1771_p8 }
  0x19   :  { %1779 = shalt.err (!%p1776_p10)
}
  0x1a   :  { %s1780_s3 = scalar_lea.vmem %s23_s16, 256  ;;  %p1785_p12 = scmp.lt.s32.totalorder %s23_s16, %s23_s16 }
  0x1b   :  { %p1781_p11 = scmp.ne.s32.totalorder %s23_s16, %s1780_s3  ;;  %p1786_p13 = scmp.lt.s32.totalorder %s1780_s3, %s1780_s3 }
  0x1d   :  { %p1787_p0 = por %p1786_p13, %p1785_p12 }
  0x1f   :  { %p1788_p1 = pnand %p1787_p0, %p1781_p11 }
  0x21   :  { %1791 = shalt.err (!%p1788_p1)
}
  0x22   :  { %25 = dma.hbm_to_vmem [thread:$0]  %s1978_s1, 256, %s23_s16, [#allocation3]  }
  0x23   :  { %s1792_s30 = scalar_lea.hbm %s1982_s5, 3072 }
  0x24   :  { %p1793_p2 = scmp.ne.s32.totalorder %s1982_s5, %s1792_s30  ;;  %p1796_p3 = scmp.lt.u32.totalorder %s1792_s30, %s1982_s5 }
  0x26   :  { %p1798_p4 = pnand %p1796_p3, %p1793_p2 }
  0x28   :  { %1801 = shalt.err (!%p1798_p4)
}
  0x29   :  { %s1802_s12 = scalar_lea.vmem %s48_s18, 3072  ;;  %p1807_p6 = scmp.lt.s32.totalorder %s48_s18, %s48_s18 }
  0x2a   :  { %p1803_p5 = scmp.ne.s32.totalorder %s48_s18, %s1802_s12  ;;  %p1808_p7 = scmp.lt.s32.totalorder %s1802_s12, %s1802_s12 }
  0x2c   :  { %p1809_p8 = por %p1808_p7, %p1807_p6 }
  0x2e   :  { %p1810_p9 = pnand %p1809_p8, %p1803_p5 }
  0x30   :  { %1813 = shalt.err (!%p1810_p9)
}
  0x31   :  { %s1823_s1 = smov 64   ;;  %s1824_s13 = smov 4  }
  0x32   :  { %53 = dma.hbm_to_vmem [thread:$0]  %s1982_s5, 3072, %s48_s18, [#allocation5], %s1823_s1, %s1823_s1, %s1824_s13  }
  0x33   :  { %1814 = dma.done.wait [#allocation3], 256  }
  0x34   :  { %1815 = vsyncadd [#allocation3], 4294967040 }
  0x35   :  { %1816 = dma.done.wait [#allocation5], 15360  }
  0x36   :  { %1817 = vsyncadd [#allocation5], 4294951936  ;;  %v1825_v0 = vmov 0   ;;  %v1826_v1 = vmov 2   ;;  %v66_v2 = vld [vmem:[%s1977_s0] sm:$0xff]  ;;  %v1827_v7 = vmov 1   ;;  %v76_v54 = vlaneseq }
  0x37   :  { %1592 = vset.pattern.permute.xlu0 %v1825_v0  ;;  %1594 = vset.pattern.permute.xlu1 %v1826_v1  ;;  %v1596_v3 = vld [vmem:[#allocation4 + $0x4] ss:$12 sps:$4 sm:$0xff]   ;;  %v1598_v4 = vld [vmem:[#allocation4] ss:$12 sps:$4 sm:$0xff]   ;;  %v1599_v5 = vld [vmem:[#allocation4 + $0x1c] ss:$12 sps:$4 sm:$0xff]  }
  0x38   :  { %71 = vperm.xlu0 %1592, %v66_v2   ;;  %165 = vperm.xlu1 %1594, %v66_v2   ;;  %v1601_v6 = vld [vmem:[#allocation4 + $0x18] ss:$12 sps:$4 sm:$0xff]   ;;  %v1602_v8 = vld [vmem:[#allocation4 + $0x34] ss:$12 sps:$4 sm:$0xff]   ;;  %v1604_v9 = vld [vmem:[#allocation4 + $0x30] ss:$12 sps:$4 sm:$0xff]  }
  0x39   :  { %903 = vmatprep.subr.bf16.mxu0 %v1596_v3  ;;  %v1605_v10 = vld [vmem:[#allocation4 + $0x4c] ss:$12 sps:$4 sm:$0xff]   ;;  %v1607_v11 = vld [vmem:[#allocation4 + $0x48] ss:$12 sps:$4 sm:$0xff]   ;;  %v1608_v13 = vld [vmem:[#allocation4 + $0x64] ss:$12 sps:$4 sm:$0xff]  }
  0x3a   :  { %904 = vmatpush1.bf16.msra.mxu0 %v1598_v4  ;;  %v1622_v12 = vld [vmem:[#allocation4 + $0xc8] ss:$12 sps:$4 sm:$0xff]   ;;  %v1610_v15 = vld [vmem:[#allocation4 + $0x60] ss:$12 sps:$4 sm:$0xff]   ;;  %v1613_v19 = vld [vmem:[#allocation4 + $0x78] ss:$12 sps:$4 sm:$0xff]  }
  0x3b   :  { %905 = vmatprep.subr.bf16.mxu0 %v1599_v5  ;;  %1479 = vmatprep.subr.bf16.mxu1 %v1622_v12  ;;  %v1624_v14 = vld [vmem:[#allocation4 + $0x8] ss:$12 sps:$4 sm:$0xff]   ;;  %v1627_v17 = vld [vmem:[#allocation4 + $0xe0] ss:$12 sps:$4 sm:$0xff]   ;;  %v1632_v20 = vld [vmem:[#allocation4 + $0xf8] ss:$12 sps:$4 sm:$0xff]  }
  0x3c   :  { %1593 = vset.pattern.permute.xlu0 %v1827_v7  ;;  %v1611_v16 = vld [vmem:[#allocation4 + $0x7c] ss:$12 sps:$4 sm:$0xff]   ;;  %1480 = vmatpush3.bf16.msra.mxu1 %v1624_v14  ;;  %v1629_v18 = vld [vmem:[#allocation4 + $0x20] ss:$12 sps:$4 sm:$0xff]   ;;  %v1634_v21 = vld [vmem:[#allocation4 + $0x38] ss:$12 sps:$4 sm:$0xff]  }
  0x3d   :  { %117 = vperm.xlu0 %1593, %v66_v2   ;;  %1481 = vmatprep.subr.bf16.mxu1 %v1627_v17  ;;  %v1614_v22 = vld [vmem:[#allocation4 + $0x94] ss:$12 sps:$4 sm:$0xff]   ;;  %v1637_v23 = vld [vmem:[#allocation4 + $0x110] ss:$12 sps:$4 sm:$0xff]   ;;  %v1617_v26 = vld [vmem:[#allocation4 + $0xac] ss:$12 sps:$4 sm:$0xff]  }
  0x3e   :  { %906 = vmatpush1.bf16.msra.mxu0 %v1601_v6  ;;  %v1616_v24 = vld [vmem:[#allocation4 + $0x90] ss:$12 sps:$4 sm:$0xff]   ;;  %v1642_v27 = vld [vmem:[#allocation4 + $0x128] ss:$12 sps:$4 sm:$0xff]   ;;  %v1647_v31 = vld [vmem:[#allocation4 + $0x140] ss:$12 sps:$4 sm:$0xff]  }
  0x3f   :  { %907 = vmatprep.subr.bf16.mxu0 %v1602_v8  ;;  %v1639_v25 = vld [vmem:[#allocation4 + $0x50] ss:$12 sps:$4 sm:$0xff]   ;;  %v1619_v28 = vld [vmem:[#allocation4 + $0xa8] ss:$12 sps:$4 sm:$0xff]   ;;  %v1623_v32 = vld [vmem:[#allocation4 + $0xc0] ss:$12 sps:$4 sm:$0xff]  }
  0x40   :  { %1482 = vmatpush3.bf16.msra.mxu1 %v1629_v18  ;;  %v1644_v29 = vld [vmem:[#allocation4 + $0x68] ss:$12 sps:$4 sm:$0xff]   ;;  %v1620_v30 = vld [vmem:[#allocation4 + $0xc4] ss:$12 sps:$4 sm:$0xff]   ;;  %v1649_v34 = vld [vmem:[#allocation4 + $0x80] ss:$12 sps:$4 sm:$0xff]  }
  0x41   :  { %1595 = vset.pattern.permute.xlu0 %v1826_v1  ;;  %1483 = vmatprep.subr.bf16.mxu1 %v1632_v20  ;;  %v1625_v33 = vld [vmem:[#allocation4 + $0xdc] ss:$12 sps:$4 sm:$0xff]   ;;  %v1652_v35 = vld [vmem:[#allocation4 + $0x158] ss:$12 sps:$4 sm:$0xff]   ;;  %v1630_v38 = vld [vmem:[#allocation4 + $0xf4] ss:$12 sps:$4 sm:$0xff]  }
  0x42   :  { %908 = vmatpush1.bf16.msra.mxu0 %v1604_v9  ;;  %v1628_v36 = vld [vmem:[#allocation4 + $0xd8] ss:$12 sps:$4 sm:$0xff]   ;;  %v1657_v39 = vld [vmem:[#allocation4 + $0x170] ss:$12 sps:$4 sm:$0xff]   ;;  %v1663_v43 = vld [vmem:[#allocation4 + $0x248] ss:$12 sps:$4 sm:$0xff]  }
  0x43   :  { %909 = vmatprep.subr.bf16.mxu0 %v1605_v10  ;;  %v1654_v37 = vld [vmem:[#allocation4 + $0x98] ss:$12 sps:$4 sm:$0xff]   ;;  %v1633_v40 = vld [vmem:[#allocation4 + $0xf0] ss:$12 sps:$4 sm:$0xff]   ;;  %v1638_v44 = vld [vmem:[#allocation4 + $0x108] ss:$12 sps:$4 sm:$0xff]  }
  0x44   :  { %1484 = vmatpush3.bf16.msra.mxu1 %v1634_v21  ;;  %v1635_v41 = vld [vmem:[#allocation4 + $0x10c] ss:$12 sps:$4 sm:$0xff]   ;;  %v1659_v42 = vld [vmem:[#allocation4 + $0xb0] ss:$12 sps:$4 sm:$0xff]   ;;  %v1650_v49 = vld [vmem:[#allocation4 + $0x154] ss:$12 sps:$4 sm:$0xff]  }
  0x45   :  { %1485 = vmatprep.subr.bf16.mxu1 %v1637_v23  ;;  %v1640_v45 = vld [vmem:[#allocation4 + $0x124] ss:$12 sps:$4 sm:$0xff]   ;;  %v1643_v46 = vld [vmem:[#allocation4 + $0x120] ss:$12 sps:$4 sm:$0xff]   ;;  %v1645_v47 = vld [vmem:[#allocation4 + $0x13c] ss:$12 sps:$4 sm:$0xff]  }
  0x46   :  { %910 = vmatpush1.bf16.msra.mxu0 %v1607_v11  ;;  %v1648_v48 = vld [vmem:[#allocation4 + $0x138] ss:$12 sps:$4 sm:$0xff]   ;;  %v1653_v50 = vld [vmem:[#allocation4 + $0x150] ss:$12 sps:$4 sm:$0xff]   ;;  %v1658_v52 = vld [vmem:[#allocation4 + $0x168] ss:$12 sps:$4 sm:$0xff]  }
  0x47   :  { %911 = vmatprep.subr.bf16.mxu0 %v1608_v13  ;;  %v1655_v51 = vld [vmem:[#allocation4 + $0x16c] ss:$12 sps:$4 sm:$0xff]   ;;  %v1662_v53 = vld [vmem:[#allocation4 + $0x184] ss:$12 sps:$4 sm:$0xff]   ;;  %v77_v55 = vshrl.u32 %v76_v54, 7  ;;  %vm1829_vm0 = vmmov 0  }
  0x48   :  { %1486 = vmatpush3.bf16.msra.mxu1 %v1639_v25  ;;  %v67_v57 = vld [vmem:[#allocation2] sm:$0x77]  ;;  %v1913_v61 = vld [vmem:[#allocation2 + $0x8] sm:$0x77]  ;;  %vm1350_vm1 = vcmask 7168  }
  0x49   :  { %1487 = vmatprep.subr.bf16.mxu1 %v1642_v27  ;;  %v1909_v56 = vsub.s32 0, %v77_v55  ;;  %v82_v58 = vsub.s32 4, %v77_v55  ;;  %v1911_v59 = vsub.s32 2, %v77_v55  ;;  %v174_v60 = vsub.s32 6, %v77_v55  ;;  %v1940_v21 = vld [vmem:[%s1979_s2] sm:$0xf] }
  0x4a   :  { %912 = vmatpush1.bf16.msra.mxu0 %v1610_v15  ;;  %v1915_v62 = vsub.s32 1, %v77_v55  ;;  %v126_v63 = vsub.s32 5, %v77_v55  ;;  %v1665_v54 = vld [vmem:[#allocation4 + $0x198] ss:$12 sps:$4 sm:$0xff]  }
  0x4b   :  { %913 = vmatprep.subr.bf16.mxu0 %v1611_v16  ;;  %v79_v0 = vrot.slane %v67_v57, %v1909_v56  ;;  %v83_v1 = vrot.slane %v67_v57, %v82_v58  ;;  %v91_v2 = vrot.slane %v1913_v61, %v82_v58  ;;  %v171_v3 = vrot.slane %v67_v57, %v1911_v59  ;;  %v1672_v58 = vld [vmem:[#allocation4 + $0x1b4] ss:$12 sps:$4 sm:$0xff]  }
  0x4c   :  { %1488 = vmatpush3.bf16.msra.mxu1 %v1644_v29  ;;  %v175_v4 = vrot.slane %v67_v57, %v174_v60  ;;  %v123_v5 = vrot.slane %v67_v57, %v1915_v62  ;;  %v127_v6 = vrot.slane %v67_v57, %v126_v63  ;;  %v135_v7 = vrot.slane %v1913_v61, %v126_v63 }
  0x4d   :  { %1489 = vmatprep.subr.bf16.mxu1 %v1647_v31  ;;  %v183_v8 = vrot.slane %v1913_v61, %v174_v60  ;;  %v99_v9 = vrot.slane %v79_v0, %v1909_v56  ;;  %v103_v11 = vrot.slane %v83_v1, %v1909_v56  ;;  %v111_v12 = vrot.slane %v91_v2, %v1909_v56  ;;  %v1673_v60 = vld [vmem:[#allocation4 + $0x278] ss:$12 sps:$4 sm:$0xff]   ;;  %v1670_v0 = vld [vmem:[#allocation4 + $0x1b0] ss:$12 sps:$4 sm:$0xff]  }
  0x4e   :  { %914 = vmatpush1.bf16.msra.mxu0 %v1613_v19  ;;  %v191_v13 = vrot.slane %v171_v3, %v1911_v59  ;;  %v195_v14 = vrot.slane %v175_v4, %v1911_v59  ;;  %v143_v15 = vrot.slane %v123_v5, %v1915_v62  ;;  %v147_v16 = vrot.slane %v127_v6, %v1915_v62  ;;  %v1674_v1 = vld [vmem:[#allocation4 + $0x1b8] ss:$12 sps:$4 sm:$0xff]   ;;  %v1678_v5 = vld [vmem:[#allocation4 + $0x290] ss:$12 sps:$4 sm:$0xff]  }
  0x4f   :  { %915 = vmatprep.subr.bf16.mxu0 %v1614_v22  ;;  %v155_v17 = vrot.slane %v135_v7, %v1915_v62  ;;  %v203_v18 = vrot.slane %v183_v8, %v1911_v59  ;;  %v228_v22 = vsub.s32 3, %v77_v55  ;;  %v1669_v55 = vld [vmem:[#allocation4 + $0x1a0] ss:$12 sps:$4 sm:$0xff]   ;;  %v131_v57 = vrot.slane %v1913_v61, %v1915_v62  ;;  %v1675_v7 = vld [vmem:[#allocation4 + $0x1c8] ss:$12 sps:$4 sm:$0xff]  }
  0x50   :  { %1490 = vmatpush3.bf16.msra.mxu1 %v1649_v34  ;;  %v87_v63 = vrot.slane %v1913_v61, %v1909_v56  ;;  %v179_v3 = vrot.slane %v1913_v61, %v1911_v59  ;;  %v1677_v4 = vld [vmem:[#allocation4 + $0x1cc] ss:$12 sps:$4 sm:$0xff]   ;;  %v1679_v8 = vld [vmem:[#allocation4 + $0x1d0] ss:$12 sps:$4 sm:$0xff]  }
  0x51   :  { %1491 = vmatprep.subr.bf16.mxu1 %v1652_v35  ;;  %v151_v2 = vrot.slane %v131_v57, %v1915_v62  ;;  %v1680_v61 = vld [vmem:[#allocation4 + $0x1e0] ss:$12 sps:$4 sm:$0xff]   ;;  %v1730_v57 = vld [vmem:[#allocation6 + $0x58] sm:$0xff]  }
  0x52   :  { %916 = vmatpush1.bf16.msra.mxu0 %v1616_v24  ;;  %v107_v6 = vrot.slane %v87_v63, %v1909_v56  ;;  %v1733_v63 = vld [vmem:[#allocation6 + $0x20] sm:$0xff]  }
  0x53   :  { %917 = vmatprep.subr.bf16.mxu0 %v1617_v26 }
  0x54   :  { %1492 = vmatpush3.bf16.msra.mxu1 %v1654_v37  ;;  %v229_v37 = vrot.slane %v1940_v21, %v228_v22  ;;  %v1685_v22 = vld [vmem:[#allocation4 + $0x1f8] ss:$12 sps:$4 sm:$0xff]  }
  0x55   :  { %1493 = vmatprep.subr.bf16.mxu1 %v1657_v39 }
  0x56   :  { %918 = vmatpush1.bf16.msra.mxu0 %v1619_v28 }
  0x57   :  { %919 = vmatprep.subr.bf16.mxu0 %v1620_v30 }
  0x58   :  { %1494 = vmatpush3.bf16.msra.mxu1 %v1659_v42 }
  0x59   :  { %1501 = vmatprep.subr.bf16.mxu1 %v1663_v43 }
  0x5a   :  { %920 = vmatpush1.bf16.msra.mxu0 %v1623_v32  ;;  %v221_v32 = vrot.slane %v1940_v21, %v1915_v62 }
  0x5b   :  { %921 = vmatprep.subr.bf16.mxu0 %v1625_v33  ;;  %v217_v33 = vrot.slane %v1940_v21, %v1909_v56 }
  0x5e   :  { %922 = vmatpush1.bf16.msra.mxu0 %v1628_v36 }
  0x5f   :  { %923 = vmatprep.subr.bf16.mxu0 %v1630_v38 }
  0x62   :  { %924 = vmatpush1.bf16.msra.mxu0 %v1633_v40 }
  0x63   :  { %925 = vmatprep.subr.bf16.mxu0 %v1635_v41 }
  0x66   :  { %926 = vmatpush1.bf16.msra.mxu0 %v1638_v44 }
  0x67   :  { %927 = vmatprep.subr.bf16.mxu0 %v1640_v45 }
  0x6a   :  { %928 = vmatpush1.bf16.msra.mxu0 %v1643_v46 }
  0x6b   :  { %929 = vmatprep.subr.bf16.mxu0 %v1645_v47 }
  0x6e   :  { %930 = vmatpush1.bf16.msra.mxu0 %v1648_v48  ;;  %v1660_v48 = vld [vmem:[#allocation4 + $0x180] ss:$12 sps:$4 sm:$0xff]  }
  0x6f   :  { %931 = vmatprep.subr.bf16.mxu0 %v1650_v49 }
  0x72   :  { %932 = vmatpush1.bf16.msra.mxu0 %v1653_v50  ;;  %v1664_v50 = vld [vmem:[#allocation4 + $0x188] ss:$12 sps:$4 sm:$0xff]  }
  0x73   :  { %933 = vmatprep.subr.bf16.mxu0 %v1655_v51  ;;  %v1667_v51 = vld [vmem:[#allocation4 + $0x19c] ss:$12 sps:$4 sm:$0xff]  }
  0x76   :  { %934 = vmatpush1.bf16.msra.mxu0 %v1658_v52  ;;  %v1668_v52 = vld [vmem:[#allocation4 + $0x260] ss:$12 sps:$4 sm:$0xff]  }
  0x77   :  { %944 = vmatprep.subr.bf16.mxu0 %v1662_v53 }
  0xb7   :  { %v1924_v10 = vpop.permute.xlu0 %71  ;;  %v1934_v19 = vpop.permute.xlu1 %165 }
  0xb8   :  { %v112_v20 = vmul.f32 %v99_v9, %v1924_v10  ;;  %v113_v23 = vmul.f32 %v103_v11, %v1924_v10  ;;  %v115_v24 = vmul.f32 %v111_v12, %v1924_v10  ;;  %v204_v26 = vmul.f32 %v191_v13, %v1934_v19  ;;  %v1682_v12 = vld [vmem:[#allocation4 + $0x1e4] ss:$12 sps:$4 sm:$0xff]   ;;  %v1683_v13 = vld [vmem:[#allocation4 + $0x2a8] ss:$12 sps:$4 sm:$0xff]  }
  0xb9   :  { %v205_v27 = vmul.f32 %v195_v14, %v1934_v19  ;;  %v207_v31 = vmul.f32 %v203_v18, %v1934_v19  ;;  %v199_v11 = vrot.slane %v179_v3, %v1911_v59  ;;  %v114_v14 = vmul.f32 %v107_v6, %v1924_v10  ;;  %v1687_v18 = vld [vmem:[#allocation4 + $0x1fc] ss:$12 sps:$4 sm:$0xff]   ;;  %v1692_v10 = vld [vmem:[#allocation4 + $0x214] ss:$12 sps:$4 sm:$0xff]  }
  0xba   :  { %v1737_v3 = vld [vmem:[#allocation6 + $0x30] sm:$0xff]   ;;  %v1828_v6 = vmov 0.0  }
  0xbc   :  { %v118_v25 = vpop.permute.xlu0 %117 }
  0xbd   :  { %v156_v28 = vmul.f32 %v143_v15, %v118_v25  ;;  %v157_v29 = vmul.f32 %v147_v16, %v118_v25  ;;  %v159_v30 = vmul.f32 %v155_v17, %v118_v25  ;;  %v158_v9 = vmul.f32 %v151_v2, %v118_v25  ;;  %v1684_v15 = vld [vmem:[#allocation4 + $0x1e8] ss:$12 sps:$4 sm:$0xff]  }
  0xbe   :  { %v206_v17 = vmul.f32 %v199_v11, %v1934_v19  ;;  %v1694_v19 = vld [vmem:[#allocation4 + $0x218] ss:$12 sps:$4 sm:$0xff]   ;;  %v1736_v2 = vld [vmem:[#allocation6 + $0x70] sm:$0xff]  }
  0xbf   :  { %v160_v34 = vadd.f32 %v156_v28, %v112_v20  ;;  %v161_v35 = vadd.f32 %v157_v29, %v113_v23  ;;  %v163_v36 = vadd.f32 %v159_v30, %v115_v24  ;;  %v162_v16 = vadd.f32 %v158_v9, %v114_v14  ;;  %v1688_v20 = vld [vmem:[#allocation4 + $0x2c0] ss:$12 sps:$4 sm:$0xff]   ;;  %v1698_v30 = vld [vmem:[#allocation4 + $0x2f0] ss:$12 sps:$4 sm:$0xff]  }
  0xc0   :  { %v1689_v23 = vld [vmem:[#allocation4 + $0x200] ss:$12 sps:$4 sm:$0xff]   ;;  %v225_v24 = vrot.slane %v1940_v21, %v1911_v59  ;;  %v1702_v21 = vld [vmem:[#allocation4 + $0x244] ss:$12 sps:$4 sm:$0xff]  }
  0xc1   :  { %v208_v38 = vadd.f32 %v204_v26, %v160_v34  ;;  %v211_v39 = vadd.f32 %v207_v31, %v163_v36  ;;  %v209_v40 = vadd.f32 %v205_v27, %v161_v35  ;;  %v210_v25 = vadd.f32 %v206_v17, %v162_v16  ;;  %v1693_v26 = vld [vmem:[#allocation4 + $0x2d8] ss:$12 sps:$4 sm:$0xff]   ;;  %v1690_v27 = vld [vmem:[#allocation4 + $0x210] ss:$12 sps:$4 sm:$0xff]   ;;  %v1695_v31 = vld [vmem:[#allocation4 + $0x228] ss:$12 sps:$4 sm:$0xff]  }
  0xc2   :  { %v1697_v29 = vld [vmem:[#allocation4 + $0x22c] ss:$12 sps:$4 sm:$0xff]   ;;  %v1705_v36 = vld [vmem:[#allocation4 + $0x25c] ss:$12 sps:$4 sm:$0xff]  }
  0xc3   :  { %v235_v41 = vadd.f32 %v221_v32, %v209_v40  ;;  %v234_v42 = vadd.f32 %v217_v33, %v208_v38  ;;  %v237_v43 = vadd.f32 %v229_v37, %v211_v39  ;;  %v236_v28 = vadd.f32 %v225_v24, %v210_v25  ;;  %v1699_v32 = vld [vmem:[#allocation4 + $0x230] ss:$12 sps:$4 sm:$0xff]   ;;  %v1700_v34 = vld [vmem:[#allocation4 + $0x240] ss:$12 sps:$4 sm:$0xff]   ;;  %v1703_v37 = vld [vmem:[#allocation4 + $0x258] ss:$12 sps:$4 sm:$0xff]  }
  0xc4   :  { %v1708_v38 = vld [vmem:[#allocation4 + $0x274] ss:$12 sps:$4 sm:$0xff]   ;;  %v1706_v39 = vld [vmem:[#allocation4 + $0x270] ss:$12 sps:$4 sm:$0xff]   ;;  %v1711_v40 = vld [vmem:[#allocation4 + $0x28c] ss:$12 sps:$4 sm:$0xff]  }
  0xc5   :  { %v239_v44 = vmax.f32 %v235_v41, 0.0  ;;  %v238_v45 = vmax.f32 %v234_v42, 0.0  ;;  %v241_v46 = vmax.f32 %v237_v43, 0.0  ;;  %v240_v33 = vmax.f32 %v236_v28, 0.0  ;;  %v1709_v41 = vld [vmem:[#allocation4 + $0x288] ss:$12 sps:$4 sm:$0xff]  }
  0xc6   :  { %v1714_v42 = vld [vmem:[#allocation4 + $0x2a4] ss:$12 sps:$4 sm:$0xff]   ;;  %v1712_v43 = vld [vmem:[#allocation4 + $0x2a0] ss:$12 sps:$4 sm:$0xff]  }
  0xc7   :  { %v243_v47 = vpack.c.bf16 %v239_v44, %v239_v44  ;;  %v242_v49 = vpack.c.bf16 %v238_v45, %v238_v45  ;;  %v245_v53 = vpack.c.bf16 %v241_v46, %v241_v46  ;;  %v244_v35 = vpack.c.bf16 %v240_v33, %v240_v33  ;;  %v1717_v44 = vld [vmem:[#allocation4 + $0x2bc] ss:$12 sps:$4 sm:$0xff]   ;;  %v1715_v45 = vld [vmem:[#allocation4 + $0x2b8] ss:$12 sps:$4 sm:$0xff]   ;;  %v1720_v46 = vld [vmem:[#allocation4 + $0x2d4] ss:$12 sps:$4 sm:$0xff]  }
  0xc8   :  { %v1744_v33 = vld [vmem:[#allocation6 + $0xa0] sm:$0xff]  }
  0xc9   :  { %935 = vmatprep.mubr.bf16.mxu0 %v243_v47  ;;  %1017 = vmatprep.mubr.bf16.mxu1 %v243_v47  ;;  %v1718_v47 = vld [vmem:[#allocation4 + $0x2d0] ss:$12 sps:$4 sm:$0xff]  }
  0xca   :  { %936 = vmatmul.mubr.bf16.vlgmr.msra.gmra.mrb[0].mxu0 %v242_v49  ;;  %1018 = vmatmul.mubr.bf16.vlgmr.msra.gmra.mrb[0].mxu1 %v242_v49  ;;  %v1721_v49 = vld [vmem:[#allocation4 + $0x2e8] ss:$12 sps:$4 sm:$0xff]  }
  0xcb   :  { %945 = vmatpush1.bf16.msra.mxu0 %v1660_v48  ;;  %1502 = vmatpush3.bf16.msra.mxu1 %v1664_v50  ;;  %v1723_v48 = vld [vmem:[#allocation4 + $0x2ec] ss:$12 sps:$4 sm:$0xff]   ;;  %v1724_v50 = vld [vmem:[#allocation6 + $0x40] sm:$0xff]  }
  0xcc   :  { %976 = vmatprep.mubr.bf16.mxu0 %v245_v53  ;;  %1057 = vmatprep.mubr.bf16.mxu1 %v245_v53  ;;  %v1727_v53 = vld [vmem:[#allocation6 + $0x8] sm:$0xff]  }
  0xcd   :  { %946 = vmatprep.subr.bf16.mxu0 %v1667_v51  ;;  %1503 = vmatprep.subr.bf16.mxu1 %v1668_v52  ;;  %v1725_v51 = vld [vmem:[#allocation6] sm:$0xff]   ;;  %v1726_v52 = vld [vmem:[#allocation6 + $0x48] sm:$0xff]  }
  0xcf   :  { %947 = vmatpush1.bf16.msra.mxu0 %v1665_v54  ;;  %1504 = vmatpush3.bf16.msra.mxu1 %v1669_v55  ;;  %v1728_v54 = vld [vmem:[#allocation6 + $0x50] sm:$0xff]  }
  0xd0   :  { %948 = vmatprep.subr.bf16.mxu0 %v1672_v58  ;;  %1505 = vmatprep.subr.bf16.mxu1 %v1673_v60  ;;  %v1729_v55 = vld [vmem:[#allocation6 + $0x10] sm:$0xff]   ;;  %v1731_v58 = vld [vmem:[#allocation6 + $0x18] sm:$0xff]   ;;  %v1732_v60 = vld [vmem:[#allocation6 + $0x60] sm:$0xff]  }
  0xd3   :  { %949 = vmatpush1.bf16.msra.mxu0 %v1670_v0  ;;  %1506 = vmatpush3.bf16.msra.mxu1 %v1674_v1  ;;  %v1734_v0 = vld [vmem:[#allocation6 + $0x68] sm:$0xff]  }
  0xd4   :  { %950 = vmatprep.subr.bf16.mxu0 %v1677_v4  ;;  %1507 = vmatprep.subr.bf16.mxu1 %v1678_v5  ;;  %v1735_v1 = vld [vmem:[#allocation6 + $0x28] sm:$0xff]   ;;  %v1738_v4 = vld [vmem:[#allocation6 + $0x78] sm:$0xff]  }
  0xd5   :  { %v1739_v5 = vld [vmem:[#allocation6 + $0x38] sm:$0xff]  }
  0xd7   :  { %951 = vmatpush1.bf16.msra.mxu0 %v1675_v7  ;;  %1508 = vmatpush3.bf16.msra.mxu1 %v1679_v8 }
  0xd8   :  { %952 = vmatprep.subr.bf16.mxu0 %v1682_v12  ;;  %1509 = vmatprep.subr.bf16.mxu1 %v1683_v13  ;;  %v374_v13 = vld [vmem:[%s1981_s4] sm:$0x7] }
  0xd9   :  { %v387_v14 = vrot.slane %v374_v13, %v1911_v59  ;;  %v383_v24 = vrot.slane %v374_v13, %v1915_v62  ;;  %v1743_v62 = vld [vmem:[#allocation6 + $0x98] sm:$0xff]  }
  0xdb   :  { %953 = vmatpush1.bf16.msra.mxu0 %v1680_v61  ;;  %1510 = vmatpush3.bf16.msra.mxu1 %v1684_v15 }
  0xdc   :  { %954 = vmatprep.subr.bf16.mxu0 %v1687_v18  ;;  %1511 = vmatprep.subr.bf16.mxu1 %v1688_v20 }
  0xdf   :  { %955 = vmatpush1.bf16.msra.mxu0 %v1685_v22  ;;  %1512 = vmatpush3.bf16.msra.mxu1 %v1689_v23  ;;  %v379_v23 = vrot.slane %v374_v13, %v1909_v56  ;;  %v1742_v56 = vld [vmem:[#allocation6 + $0x90] sm:$0xff]  }
  0xe0   :  { %956 = vmatprep.subr.bf16.mxu0 %v1692_v10  ;;  %1513 = vmatprep.subr.bf16.mxu1 %v1693_v26 }
  0xe3   :  { %957 = vmatpush1.bf16.msra.mxu0 %v1690_v27  ;;  %1514 = vmatpush3.bf16.msra.mxu1 %v1694_v19 }
  0xe4   :  { %958 = vmatprep.subr.bf16.mxu0 %v1697_v29  ;;  %1515 = vmatprep.subr.bf16.mxu1 %v1698_v30 }
  0xe7   :  { %959 = vmatpush1.bf16.msra.mxu0 %v1695_v31  ;;  %1516 = vmatpush3.bf16.msra.mxu1 %v1699_v32  ;;  %v1740_v31 = vld [vmem:[#allocation6 + $0x80] sm:$0xff]  }
  0xe8   :  { %960 = vmatprep.subr.bf16.mxu0 %v1702_v21  ;;  %1523 = vmatprep.subr.bf16.mxu1 %v1724_v50  ;;  %v1741_v21 = vld [vmem:[#allocation6 + $0x88] sm:$0xff]  }
  0xea   :  { %1058 = vmatmul.mubr.bf16.vlgmr.msra.gmra.mrb[4].mxu1 %v244_v35 }
  0xeb   :  { %961 = vmatpush1.bf16.msra.mxu0 %v1700_v34  ;;  %1524 = vmatpush3.bf16.msra.mxu1 %v1725_v51  ;;  %v1745_v34 = vld [vmem:[#allocation6 + $0xa8] sm:$0xff]  }
  0xec   :  { %962 = vmatprep.subr.bf16.mxu0 %v1705_v36  ;;  %1525 = vmatprep.subr.bf16.mxu1 %v1726_v52  ;;  %v1747_v36 = vld [vmem:[#allocation6 + $0xb8] sm:$0xff]  }
  0xef   :  { %963 = vmatpush1.bf16.msra.mxu0 %v1703_v37  ;;  %1526 = vmatpush3.bf16.msra.mxu1 %v1727_v53 }
  0xf0   :  { %964 = vmatprep.subr.bf16.mxu0 %v1708_v38  ;;  %1527 = vmatprep.subr.bf16.mxu1 %v1728_v54 }
  0xf3   :  { %965 = vmatpush1.bf16.msra.mxu0 %v1706_v39  ;;  %1528 = vmatpush3.bf16.msra.mxu1 %v1729_v55 }
  0xf4   :  { %966 = vmatprep.subr.bf16.mxu0 %v1711_v40  ;;  %1529 = vmatprep.subr.bf16.mxu1 %v1730_v57 }
  0xf7   :  { %967 = vmatpush1.bf16.msra.mxu0 %v1709_v41  ;;  %1530 = vmatpush3.bf16.msra.mxu1 %v1731_v58 }
  0xf8   :  { %968 = vmatprep.subr.bf16.mxu0 %v1714_v42  ;;  %1531 = vmatprep.subr.bf16.mxu1 %v1732_v60 }
  0xfb   :  { %969 = vmatpush1.bf16.msra.mxu0 %v1712_v43  ;;  %1532 = vmatpush3.bf16.msra.mxu1 %v1733_v63 }
  0xfc   :  { %970 = vmatprep.subr.bf16.mxu0 %v1717_v44  ;;  %1533 = vmatprep.subr.bf16.mxu1 %v1734_v0  ;;  %v1454_v44 = vld [vmem:[%s1983_s6] ss:$0 sm:$0xff] }
  0xff   :  { %971 = vmatpush1.bf16.msra.mxu0 %v1715_v45  ;;  %1534 = vmatpush3.bf16.msra.mxu1 %v1735_v1 }
 0x100   :  { %972 = vmatprep.subr.bf16.mxu0 %v1720_v46  ;;  %1535 = vmatprep.subr.bf16.mxu1 %v1736_v2 }
 0x103   :  { %973 = vmatpush1.bf16.msra.mxu0 %v1718_v47  ;;  %1536 = vmatpush3.bf16.msra.mxu1 %v1737_v3 }
 0x104   :  { %974 = vmatprep.subr.bf16.mxu0 %v1723_v48  ;;  %1537 = vmatprep.subr.bf16.mxu1 %v1738_v4 }
 0x107   :  { %975 = vmatpush1.bf16.msra.mxu0 %v1721_v49  ;;  %1538 = vmatpush3.bf16.msra.mxu1 %v1739_v5 }
 0x108   :  { %1554 = vmatprep.subr.bf16.mxu1 %v1828_v6 }
 0x10a   :  { %977 = vmatmul.mubr.bf16.vlgmr.msra.gmra.mrb[0].mxu0 %v244_v35  ;;  %v1746_v35 = vld [vmem:[#allocation6 + $0xb0] sm:$0xff]  }
 0x19d   :  { %v1495_v7 = vpop.f32.mrb[0].mxu1 }
 0x19e   :  { %v1496_v8 = vpop.f32.mrb[1].mxu1 }
 0x19f   :  { %v1497_v9 = vadd.f32 %v1496_v8, %v1495_v7  ;;  %v1498_v11 = vpop.f32.mrb[2].mxu1 }
 0x1a0   :  { %v1499_v12 = vpop.f32.mrb[3].mxu1 }
 0x1a1   :  { %v1020_v16 = vadd.f32 %v1497_v9, %v387_v14 }
 0x1bd   :  { %v1517_v61 = vpop.f32.mrb[4].mxu1 }
 0x1be   :  { %v1518_v15 = vpop.f32.mrb[5].mxu1 }
 0x1bf   :  { %v1519_v17 = vadd.f32 %v1518_v15, %v1517_v61  ;;  %v1520_v18 = vpop.f32.mrb[6].mxu1 }
 0x1c0   :  { %v1521_v20 = vpop.f32.mrb[7].mxu1 }
 0x1c1   :  { %v1060_v22 = vadd.f32 %v1519_v17, %v1020_v16 }
 0x1c3   :  { %v1067_v37 = vmax.f32 %v1060_v22, 0.0 }
 0x1c5   :  { %v1070_v38 = vpack.c.bf16 %v1067_v37, %v1067_v37 }
 0x1dd   :  { %v978_v25 = vpop.f32.mrb[0].mxu0 }
 0x1de   :  { %v1574_v10 = vadd.f32 %v978_v25, %v379_v23  ;;  %v980_v26 = vpop.f32.mrb[1].mxu0 }
 0x1df   :  { %v1575_v27 = vadd.f32 %v980_v26, %v383_v24  ;;  %v982_v19 = vpop.f32.mrb[2].mxu0 }
 0x1e0   :  { %v1065_v28 = vmax.f32 %v1574_v10, 0.0  ;;  %v983_v29 = vpop.f32.mrb[3].mxu0 }
 0x1e1   :  { %v1066_v30 = vmax.f32 %v1575_v27, 0.0 }
 0x1e2   :  { %v1068_v32 = vpack.c.bf16 %v1065_v28, %v1065_v28 }
 0x1e3   :  { %v1069_v59 = vpack.c.bf16 %v1066_v30, %v1066_v30 }
 0x1e5   :  { %1302 = vmatprep.mubr.bf16.mxu1 %v1069_v59 }
 0x1e6   :  { %1303 = vmatmul.mubr.bf16.vlgmr.msra.gmra.mrb[8].mxu1 %v1068_v32 }
 0x1e7   :  { %1555 = vmatpush3.bf16.msra.mxu1 %v1740_v31  ;;  %1570 = vmatprep.mubr.msk.bf16.mxu1 %vm1829_vm0, %v1828_v6 }
 0x1e8   :  { %1556 = vmatprep.subr.bf16.mxu1 %v1828_v6 }
 0x1eb   :  { %1557 = vmatpush3.bf16.msra.mxu1 %v1741_v21 }
 0x1ec   :  { %1558 = vmatprep.subr.bf16.mxu1 %v1828_v6 }
 0x1ef   :  { %1559 = vmatpush3.bf16.msra.mxu1 %v1742_v56 }
 0x1f0   :  { %1560 = vmatprep.subr.bf16.mxu1 %v1828_v6 }
 0x1f3   :  { %1561 = vmatpush3.bf16.msra.mxu1 %v1743_v62 }
 0x1f4   :  { %1562 = vmatprep.subr.bf16.mxu1 %v1828_v6 }
 0x1f7   :  { %1563 = vmatpush3.bf16.msra.mxu1 %v1744_v33 }
 0x1f8   :  { %1564 = vmatprep.subr.bf16.mxu1 %v1828_v6 }
 0x1fb   :  { %1565 = vmatpush3.bf16.msra.mxu1 %v1745_v34 }
 0x1fc   :  { %1566 = vmatprep.subr.bf16.mxu1 %v1828_v6 }
 0x1ff   :  { %1567 = vmatpush3.bf16.msra.mxu1 %v1746_v35 }
 0x200   :  { %1568 = vmatprep.subr.bf16.mxu1 %v1828_v6 }
 0x203   :  { %1569 = vmatpush3.bf16.msra.mxu1 %v1747_v36 }
 0x206   :  { %1571 = vmatmul.mubr.bf16.vlgmr.msra.gmra.mrb[12].mxu1 %v1070_v38 }
 0x2b9   :  { %v1539_v39 = vpop.f32.mrb[8].mxu1 }
 0x2ba   :  { %v1540_v40 = vpop.f32.mrb[9].mxu1 }
 0x2bb   :  { %v1541_v41 = vadd.f32 %v1540_v40, %v1539_v39  ;;  %v1542_v42 = vpop.f32.mrb[10].mxu1 }
 0x2bc   :  { %v1543_v43 = vpop.f32.mrb[11].mxu1 }
 0x2bd   :  { %v1305_v45 = vadd.f32 %v1541_v41, %v1454_v44 }
 0x2d9   :  { %v1344_v46 = vpop.f32.mrb[12].mxu1 }
 0x2da   :  { %v1345_v47 = vadd.f32 %v1344_v46, %v1305_v45  ;;  %v1572_v48 = vpop.f32.mrb[13].mxu1 }
 0x2db   :  { %v1347_v49 = vpop.f32.mrb[14].mxu1 }
 0x2dc   :  { %1351 = vst.msk [vmem:[%s1984_s7] sm:$0xff] %vm1350_vm1, %v1345_v47  ;;  %v1573_v50 = vpop.f32.mrb[15].mxu1 }
 0x2dd   :  { %1356 = vsyncpa [#allocation3], 1 }
 0x2de   :  { %1357 = vsyncpa [#allocation5], 1 }

</bundles_post_ra>
